<compile_context>
chip_gen: v7x
topology: tpu7x:2x2x1
jax: 0.10.0
libtpu: 0.0.40
codegen_flags: <defaults>
</compile_context>

<pallas_src>
import functools

import jax
import jax.numpy as jnp
from jax import lax
from jax.experimental import pallas as pl
from jax.experimental.pallas import tpu as pltpu


def _round_up(v: int, m: int) -> int:
    return ((v + m - 1) // m) * m


def _lane_partial(x, op):
    """Reduce (rows, n*128) -> (rows, 128) using only per-lane VALU ops."""
    n = x.shape[1] // 128
    acc = x[:, 0:128]
    for j in range(1, n):
        acc = op(acc, x[:, j * 128:(j + 1) * 128])
    return acc


def _single_kernel(x_ref, o_ref, *, pooling, hw, mask_tail, inv_hw):
    """HW fits in one block: reduce and write directly (no scratch, no pl.when)."""
    x = x_ref[...].astype(jnp.float32)
    if mask_tail:
        col = lax.broadcasted_iota(jnp.int32, x.shape, 1)
        fill = 0.0 if pooling == "avg" else -jnp.inf
        x = jnp.where(col < hw, x, fill)
    if pooling == "avg":
        part = _lane_partial(x, jnp.add)
        o_ref[...] = (jnp.sum(part, axis=-1, keepdims=True) * inv_hw).astype(o_ref.dtype)
    else:
        part = _lane_partial(x, jnp.maximum)
        o_ref[...] = jnp.max(part, axis=-1, keepdims=True).astype(o_ref.dtype)


def _loop_kernel(x_ref, o_ref, acc_ref, *, pooling, hw, hw_tile, mask_tail, inv_hw):
    """HW tiled along the last ('arbitrary') grid axis; lane-dense f32 accumulator."""
    k = pl.program_id(1)

    @pl.when(k == 0)
    def _init():
        if pooling == "avg":
            acc_ref[...] = jnp.zeros_like(acc_ref)
        else:
            acc_ref[...] = jnp.full_like(acc_ref, -jnp.inf)

    x = x_ref[...].astype(jnp.float32)
    if mask_tail:
        col = k * hw_tile + lax.broadcasted_iota(jnp.int32, x.shape, 1)
        fill = 0.0 if pooling == "avg" else -jnp.inf
        x = jnp.where(col < hw, x, fill)

    if pooling == "avg":
        acc_ref[...] += _lane_partial(x, jnp.add)
    else:
        acc_ref[...] = jnp.maximum(acc_ref[...], _lane_partial(x, jnp.maximum))

    @pl.when(k == pl.num_programs(1) - 1)
    def _finalize():
        if pooling == "avg":
            o_ref[...] = (jnp.sum(acc_ref[...], axis=-1, keepdims=True)
                          * inv_hw).astype(o_ref.dtype)
        else:
            o_ref[...] = jnp.max(acc_ref[...], axis=-1, keepdims=True).astype(o_ref.dtype)


def global_pool(x, pooling: str = "avg"):
    """x: (N, C, *spatial) float array -> (N, C). pooling in {'avg', 'max'}."""
    if pooling not in ("avg", "max"):
        raise AssertionError(f"Unrecognized pooling: {pooling}")

    N, C = x.shape[0], x.shape[1]
    hw = 1
    for d in x.shape[2:]:
        hw *= d
    R = N * C
    x_rows = x.reshape(R, hw)  # contiguous view, no data movement

    itemsize = jnp.dtype(x.dtype).itemsize
    sublane = {4: 8, 2: 16, 1: 32}.get(itemsize, 8)

    BYTES_TARGET = 8 * 1024 * 1024      # per input block (Pallas double-buffers it)
    HW_ROW_BYTES_CAP = 16 * 1024        # max bytes of one row inside a block

    # ---- hw (reduction) tiling: lane multiple of 128, balanced chunks ----
    hw_tile_cap = max(128, HW_ROW_BYTES_CAP // itemsize)   # multiple of 128
    hw_full = _round_up(hw, 128)
    if hw_full <= hw_tile_cap:
        hw_tile = hw_full
    else:
        num_k_est = pl.cdiv(hw_full, hw_tile_cap)
        hw_tile = _round_up(pl.cdiv(hw, num_k_est), 128)
    num_k = pl.cdiv(hw, hw_tile)
    mask_tail = (hw % hw_tile) != 0     # ragged HW tail -> mask in kernel

    # ---- row tiling: fill the byte budget; keep sublane alignment ----
    row_budget = max(sublane, BYTES_TARGET // (hw_tile * itemsize))
    row_tile = min(_round_up(row_budget, sublane), _round_up(R, sublane))
    # Megacore guard (v7x): avoid a single row tile when the block is big enough
    # that splitting it still amortizes per-step overhead.
    if pl.cdiv(R, row_tile) == 1 and row_tile * hw_tile * itemsize >= (2 << 20) \
            and R > 2 * sublane:
        row_tile = _round_up(pl.cdiv(row_tile, 2), sublane)
    num_row_tiles = pl.cdiv(R, row_tile)

    inv_hw = float(1.0 / hw)
    common = dict(pooling=pooling, hw=hw, mask_tail=mask_tail, inv_hw=inv_hw)

    if num_k == 1:
        kernel = functools.partial(_single_kernel, **common)
        grid = (num_row_tiles,)
        in_specs = [pl.BlockSpec((row_tile, hw_tile), lambda i: (i, 0))]
        out_specs = pl.BlockSpec((row_tile, 1), lambda i: (i, 0))
        scratch_shapes = []
        dims = ("parallel",)
    else:
        kernel = functools.partial(_loop_kernel, hw_tile=hw_tile, **common)
        grid = (num_row_tiles, num_k)
        in_specs = [pl.BlockSpec((row_tile, hw_tile), lambda i, k: (i, k))]
        # Output block resident across the reduction axis; written at k == last.
        out_specs = pl.BlockSpec((row_tile, 1), lambda i, k: (i, 0))
        scratch_shapes = [pltpu.VMEM((row_tile, 128), jnp.float32)]
        dims = ("parallel", "arbitrary")

    out = pl.pallas_call(
        kernel,
        out_shape=jax.ShapeDtypeStruct((R, 1), x.dtype),
        grid_spec=pltpu.PrefetchScalarGridSpec(
            num_scalar_prefetch=0,
            grid=grid,
            in_specs=in_specs,
            out_specs=out_specs,
            scratch_shapes=scratch_shapes,
        ),
        compiler_params=pltpu.CompilerParams(
            dimension_semantics=dims,
            vmem_limit_bytes=32 * 1024 * 1024,
        ),
    )(x_rows)

    return out[:, 0].reshape(N, C)


if __name__ == "__main__":
    key = jax.random.PRNGKey(0)

    # Shapes implied by the module's forward: NCHW.
    N, C, H, W = 2, 4, 16, 16
    x = jax.random.normal(key, (N, C, H, W), dtype=jnp.float32)

    # avg pooling (module default) — single-step path
    out_avg = global_pool(x, pooling="avg")
    jax.block_until_ready(out_avg)
    ref_avg = x.reshape(N, C, -1).mean(axis=2)
    assert out_avg.shape == (N, C)
    assert jnp.allclose(out_avg, ref_avg, atol=1e-5, rtol=1e-5)

    # max pooling branch
    out_max = global_pool(x, pooling="max")
    jax.block_until_ready(out_max)
    ref_max = x.reshape(N, C, -1).max(axis=2)
    assert jnp.allclose(out_max, ref_max, atol=1e-6, rtol=1e-6)

    # Non-multiple-of-128 spatial size, all-negative values: exercises the ragged
    # HW masking (-inf for max, 0 for avg) and the true-HW divisor.
    x2 = jax.random.normal(jax.random.PRNGKey(1), (2, 4, 5, 5), jnp.float32) - 3.0
    out_avg2 = global_pool(x2, pooling="avg")
    out_max2 = global_pool(x2, pooling="max")
    jax.block_until_ready((out_avg2, out_max2))
    assert jnp.allclose(out_avg2, x2.reshape(2, 4, -1).mean(axis=2), atol=1e-5, rtol=1e-5)
    assert jnp.allclose(out_max2, x2.reshape(2, 4, -1).max(axis=2), atol=1e-6, rtol=1e-6)

    # Large spatial map: exercises the multi-chunk (accumulator) path with a
    # ragged last chunk, for both poolings.
    x3 = jax.random.normal(jax.random.PRNGKey(2), (1, 2, 72, 72), jnp.float32)
    out_avg3 = global_pool(x3, pooling="avg")
    out_max3 = global_pool(x3, pooling="max")
    jax.block_until_ready((out_avg3, out_max3))
    assert jnp.allclose(out_avg3, x3.reshape(1, 2, -1).mean(axis=2), atol=1e-5, rtol=1e-5)
    assert jnp.allclose(out_max3, x3.reshape(1, 2, -1).max(axis=2), atol=1e-6, rtol=1e-6)

    print("KERNEL_OK")
</pallas_src>

<mosaic_0001>
module attributes {stable_mosaic.version = 11 : i64} {
  func.func @_single_kernel(%arg0: i32, %arg1: memref<8x256xf32, #tpu.memory_space<vmem>>, %arg2: memref<8x1xf32, #tpu.memory_space<vmem>>) attributes {dimension_semantics = [#tpu.dimension_semantics<parallel>], iteration_bounds = array<i64: 1>, scalar_prefetch = 0 : i64, scratch_operands = 0 : i64, tpu.core_type = #tpu.core_type<tc>, window_params = [{transform_indices = @transform_0, window_bounds = array<i64: 8, 256>}, {transform_indices = @transform_1, window_bounds = array<i64: 8, 1>}]} {
    %c0 = arith.constant 0 : index
    %c0_0 = arith.constant 0 : index
    %0 = vector.load %arg1[%c0, %c0_0] : memref<8x256xf32, #tpu.memory_space<vmem>>, vector<8x256xf32>
    %1 = vector.extract_strided_slice %0 {offsets = [0, 0], sizes = [8, 128], strides = [1, 1]} : vector<8x256xf32> to vector<8x128xf32>
    %2 = vector.extract_strided_slice %0 {offsets = [0, 128], sizes = [8, 128], strides = [1, 1]} : vector<8x256xf32> to vector<8x128xf32>
    %3 = arith.addf %1, %2 : vector<8x128xf32>
    %cst = arith.constant dense<0.000000e+00> : vector<8xf32>
    %4 = vector.multi_reduction <add>, %3, %cst [1] : vector<8x128xf32> to vector<8xf32>
    %5 = vector.shape_cast %4 : vector<8xf32> to vector<8x1xf32>
    %cst_1 = arith.constant 3.906250e-03 : f32
    %6 = vector.broadcast %cst_1 : f32 to vector<8x1xf32>
    %7 = arith.mulf %5, %6 : vector<8x1xf32>
    %c0_2 = arith.constant 0 : index
    %c0_3 = arith.constant 0 : index
    %8 = vector.load %arg2[%c0_2, %c0_3] : memref<8x1xf32, #tpu.memory_space<vmem>>, vector<8x1xf32>
    tpu.vector_store %arg2[%c0_2, %c0_3], %7 {strides = array<i32>} : memref<8x1xf32, #tpu.memory_space<vmem>>, vector<8x1xf32>,
    return
  }
  func.func @transform_0(%arg0: i32) -> (i32, i32) {
    %c0_i32 = arith.constant 0 : i32
    %c0_i32_0 = arith.constant 0 : i32
    return %arg0, %c0_i32 : i32, i32
  }
  func.func @transform_1(%arg0: i32) -> (i32, i32) {
    %c0_i32 = arith.constant 0 : i32
    %c0_i32_0 = arith.constant 0 : i32
    return %arg0, %c0_i32 : i32, i32
  }
}

</mosaic_0001>

<bundles_post_ra>
// kernel: tpu_custom_call.1
= control target key start
LH: loop header
LB: loop body
LE: loop exit
PB: predicated region body
PF: predicated region fallthrough
CT: control target
= control target key end

     0   :  { %6 = vsyncpa [#allocation3], 0  ;;  %s58_s6 = smov [#allocation2]   ;;  %s84_s0 = inlined_call_operand.hbm [shape: f32[8,256], index: 0, kind: input, shape index: {}]   ;;  %s85_s1 = inlined_call_operand.vmem [shape: f32[8,1], index: 1, kind: output, shape index: {}]  }
   0x1   :  { %s13_s7 = sshll.u32 %s58_s6, 4  ;;  %s34_s10 = scalar_lea.hbm %s84_s0, 256  ;;  %s14_s7 = int_to_ptr.vmem [resolvable:$true] %s13_s7 }
   0x2   :  { %p35_p0 = scmp.ne.s32.totalorder %s84_s0, %s34_s10  ;;  %p38_p1 = scmp.lt.u32.totalorder %s34_s10, %s84_s0 }
   0x4   :  { %p40_p2 = pnand %p38_p1, %p35_p0 }
   0x6   :  { %43 = shalt.err (!%p40_p2)
}
   0x7   :  { %s44_s15 = scalar_lea.vmem %s14_s7, 256  ;;  %p49_p4 = scmp.lt.s32.totalorder %s14_s7, %s14_s7 }
   0x8   :  { %p45_p3 = scmp.ne.s32.totalorder %s14_s7, %s44_s15  ;;  %p50_p5 = scmp.lt.s32.totalorder %s44_s15, %s44_s15 }
   0xa   :  { %p51_p6 = por %p50_p5, %p49_p4 }
   0xc   :  { %p52_p7 = pnand %p51_p6, %p45_p3 }
   0xe   :  { %55 = shalt.err (!%p52_p7)
}
   0xf   :  { %16 = dma.hbm_to_vmem [thread:$0]  %s84_s0, 256, %s14_s7, [#allocation3]  }
  0x10   :  { %56 = dma.done.wait [#allocation3], 256  }
  0x11   :  { %57 = vsyncadd [#allocation3], 4294967040  ;;  %v20_v0 = vld [vmem:[#allocation2] sm:$0xff]  ;;  %v21_v1 = vld [vmem:[#allocation2 + $0x8] sm:$0xff]  ;;  %vm26_vm0 = vcmask 7168  }
  0x12   :  { %v22_v2 = vadd.f32 %v21_v1, %v20_v0 }
  0x14   :  { %23 = vadd.xlane.f32.xlu0 %v22_v2 }
  0xa1   :  { %v24_v3 = vpop.xlane.xlu0 %23 }
  0xa2   :  { %v25_v4 = vmul.f32 0.00390625, %v24_v3 }
  0xa4   :  { %27 = vst.msk [vmem:[%s85_s1] sm:$0xff] %vm26_vm0, %v25_v4 }
  0xa5   :  { %32 = vsyncpa [#allocation3], 1 }

</bundles_post_ra>
